<compile_context>
chip_gen: v7x
topology: tpu7x:2x2x1
jax: 0.10.0
libtpu: 0.0.40
codegen_flags: <defaults>
</compile_context>

<pallas_src>
import numpy as np
import jax
import jax.numpy as jnp
from jax.experimental import pallas as pl
from jax.experimental.pallas import tpu as pltpu

E = 2.718281828459045
PI = 3.141592653589793


def _round_up(a, m):
    return (a + m - 1) // m * m


def to_hz(mel):
    return 700.0 * (E ** (mel / 1127.0) - 1.0)


def to_mel(hz):
    return 1127.0 * np.log(1.0 + hz / 700.0)


def init_sinc_params(out_channels, kernel_size, sr, min_low_hz, min_band_hz):
    """Deterministic init identical to Sinc_Conv.__init__ (mel-spaced cutoffs)."""
    if kernel_size % 2 == 0:
        kernel_size += 1
    high_hz = sr / 2.0 - (min_low_hz + min_band_hz)
    mel = np.linspace(to_mel(30.0), to_mel(high_hz), out_channels + 1)
    hz = to_hz(mel)
    low_hz = hz[:-1].reshape(-1, 1).astype(np.float32)          # (C, 1)
    band_hz = np.diff(hz).reshape(-1, 1).astype(np.float32)     # (C, 1)
    n_lin = np.linspace(0.0, kernel_size / 2.0 - 1.0, kernel_size // 2)
    window = (0.54 - 0.46 * np.cos(2.0 * PI * n_lin / kernel_size)).astype(np.float32)
    n_neg = (2.0 * PI * np.arange(-(kernel_size - 1) / 2.0, 0.0).reshape(1, -1)
             / sr).astype(np.float32)                           # (1, K//2)
    return (jnp.asarray(low_hz), jnp.asarray(band_hz),
            jnp.asarray(window), jnp.asarray(n_neg), kernel_size)


def make_sinc_filters(low_hz_p, band_hz_p, window, n_neg, min_low_hz, min_band_hz, sr):
    """Mirrors the filter construction in Sinc_Conv.forward. Returns (C, K) f32."""
    low = (min_low_hz + jnp.abs(low_hz_p)).astype(jnp.float32)             # (C, 1)
    high = jnp.clip(low + min_band_hz + jnp.abs(band_hz_p),
                    min_low_hz, sr / 2.0).astype(jnp.float32)              # (C, 1)
    band = (high - low)[:, 0]                                              # (C,)
    center = 2.0 * band[:, None]                                           # (C, 1)
    f1_low = low @ n_neg                                                   # (C, K//2)
    f2_high = high @ n_neg                                                 # (C, K//2)
    left = window * 2.0 * (jnp.sin(f2_high) - jnp.sin(f1_low)) / n_neg     # (C, K//2)
    right = jnp.flip(left, axis=1)
    band_pass = jnp.concatenate([left, center, right], axis=1)             # (C, K)
    band_pass = band_pass / (2.0 * band[:, None])
    return band_pass.astype(jnp.float32)


def sinc_conv1d_pallas(x, filters, *, l_tile=None, compute_dtype=jnp.bfloat16,
                       vmem_limit_bytes=None):
    """conv1d(x, filters), stride=1, padding=0, dilation=1, groups=1, no bias.

    x: (B, 1, L), filters: (C, K) -> (B, C, L - K + 1) float32.
    compute_dtype=bfloat16 (default) quantizes signal/filters before the MXU;
    accumulation is always f32.
    """
    # TODO(synk): only the module's default stride=1/padding=0/dilation=1/groups=1
    # conv configuration is implemented.
    B, c_in, L = x.shape
    assert c_in == 1, "Sinc_Conv requires in_channels == 1"
    C, K = filters.shape
    L_out = L - K + 1
    assert L_out > 0, "signal shorter than kernel"

    cdt = jnp.dtype(compute_dtype)
    assert cdt.itemsize in (2, 4), "compute_dtype must be bf16/f16 or f32"
    sub = 8 * (4 // cdt.itemsize)          # sublanes per vreg: 8 (f32) / 16 (bf16)

    # --- tiling ---
    h = _round_up(K, 128)                  # halo needed per tile (>= K-1), lane-dense
    if l_tile is None:
        l_tile = min(4096, _round_up(L_out, 128))
    l_tile = max(_round_up(l_tile, 128), h)   # taps must fit inside 2 adjacent tiles
    n_tiles = pl.cdiv(L_out, l_tile)

    c_pad = _round_up(C, 8)                # sublane-dense filter rows / output rows
    k_pad = _round_up(K, sub)              # patch rows, multiple of the group size
    two_lt = 2 * l_tile
    n_groups = k_pad // sub
    # Rows s>=1 of the staged signal only need the first ~l_tile + k_pad lanes.
    stage_w = min(l_tile + h, two_lt)

    # Zero-pad the signal so tile j and its halo tile j+1 are always in bounds
    # and padded output columns are computed from zeros (no OOB/stale reads).
    l_x_pad = (n_tiles + 1) * l_tile
    x_p = jnp.pad(x.astype(cdt), ((0, 0), (0, 0), (0, l_x_pad - L)))
    w_p = jnp.pad(filters.astype(cdt), ((0, c_pad - C), (0, k_pad - K)))

    def kernel(xc_ref, xn_ref, w_ref, o_ref, sig_ref, patch_ref):
        # xc_ref / xn_ref: (1, 1, l_tile) current + next (halo) signal tiles.
        # w_ref : (c_pad, k_pad) zero-padded filter bank.
        # o_ref : (1, c_pad, l_tile) output tile (f32).
        # sig_ref  : (sub, 2*l_tile) staged signal; row s is shifted left by s.
        # patch_ref: (k_pad, l_tile) im2col patch matrix.

        # Stage the signal window once (row 0 = [current | halo]).
        sig_ref[pl.ds(0, 1), pl.ds(0, l_tile)] = xc_ref[0]
        sig_ref[pl.ds(0, 1), pl.ds(l_tile, l_tile)] = xn_ref[0]
        # Rows 1..sub-1: re-load row 0 from VMEM (keeps vreg live ranges short)
        # shifted by s lanes.  The unwritten tail of a shifted row is never read.
        for s in range(1, sub):
            w_s = min(stage_w, two_lt - s)
            sig_ref[pl.ds(s, 1), pl.ds(0, w_s)] = sig_ref[pl.ds(0, 1), pl.ds(s, w_s)]

        # im2col in groups of `sub` consecutive taps: one full-sublane-density
        # lane-shifted load + one `sub`-row store per group (K/sub ops, not K).
        # patch[g*sub + s, j] = sig[s, g*sub + j] = x[base + g*sub + s + j].
        for g in range(n_groups):
            patch_ref[pl.ds(g * sub, sub), :] = sig_ref[:, pl.ds(g * sub, l_tile)]

        # Single MXU matmul with f32 accumulation (padded patch rows carry finite
        # signal values and hit zero filter weights, so no NaN risk).
        o_ref[0] = jnp.dot(
            w_ref[...], patch_ref[...],
            preferred_element_type=jnp.float32,
        ).astype(o_ref.dtype)

    cost = pl.CostEstimate(
        flops=2 * B * C * K * L_out,
        transcendentals=0,
        bytes_accessed=(B * C * L_out * 4            # output (dominant)
                        + 2 * B * l_x_pad * cdt.itemsize   # signal + halo re-read
                        + c_pad * k_pad * cdt.itemsize),
    )

    out = pl.pallas_call(
        kernel,
        out_shape=jax.ShapeDtypeStruct((B, C, L_out), jnp.float32),
        grid=(n_tiles, B),                    # long axis first: even megacore split
        in_specs=[
            pl.BlockSpec((1, 1, l_tile), lambda j, b: (b, 0, j)),       # current tile
            pl.BlockSpec((1, 1, l_tile), lambda j, b: (b, 0, j + 1)),   # halo tile
            pl.BlockSpec((c_pad, k_pad), lambda j, b: (0, 0)),          # filter bank
        ],
        out_specs=pl.BlockSpec((1, c_pad, l_tile), lambda j, b: (b, 0, j)),
        scratch_shapes=[
            pltpu.VMEM((sub, two_lt), cdt),      # staged, pre-shifted signal
            pltpu.VMEM((k_pad, l_tile), cdt),    # im2col patch
        ],
        compiler_params=pltpu.CompilerParams(
            dimension_semantics=("parallel", "parallel"),
            vmem_limit_bytes=vmem_limit_bytes),
        cost_estimate=cost,
    )(x_p, x_p, w_p)
    return out


def sinc_conv_forward(x, params, *, min_low_hz, min_band_hz, sr,
                      compute_dtype=jnp.bfloat16):
    """Full Sinc_Conv.forward: synthesize filters (plain JAX) + Pallas conv."""
    low_hz_p, band_hz_p, window, n_neg, _ = params
    filters = make_sinc_filters(low_hz_p, band_hz_p, window, n_neg,
                                min_low_hz, min_band_hz, sr)
    out = sinc_conv1d_pallas(x, filters, compute_dtype=compute_dtype)
    return out, filters


if __name__ == "__main__":
    # Small shapes consistent with the module: batch=2, in_channels=1, signal=128.
    out_channels = 8
    kernel_size = 9          # already odd (module bumps even sizes to odd)
    sr = 16000
    min_low_hz = 50.0
    min_band_hz = 50.0
    B, L = 2, 128

    params = init_sinc_params(out_channels, kernel_size, sr, min_low_hz, min_band_hz)
    K = params[-1]
    L_out = L - K + 1

    key = jax.random.PRNGKey(0)
    x = jax.random.normal(key, (B, 1, L), dtype=jnp.float32)

    filters = make_sinc_filters(params[0], params[1], params[2], params[3],
                                min_low_hz, min_band_hz, sr)

    # Pure-JAX reference for the conv hot path (im2col + einsum, f32).
    patches = jnp.stack([x[:, 0, k:k + L_out] for k in range(K)], axis=-1)  # (B, L_out, K)
    ref = jnp.einsum("blk,ck->bcl", patches, filters)
    scale = jnp.max(jnp.abs(ref))

    # Default bf16-compute path (group size 16) and f32-compute path (group size 8).
    out_bf16, _ = sinc_conv_forward(
        x, params, min_low_hz=min_low_hz, min_band_hz=min_band_hz, sr=sr,
        compute_dtype=jnp.bfloat16)
    out_bf16 = jax.block_until_ready(out_bf16)

    out_f32 = sinc_conv1d_pallas(x, filters, compute_dtype=jnp.float32)
    out_f32 = jax.block_until_ready(out_f32)

    assert out_bf16.shape == (B, out_channels, L_out), out_bf16.shape
    assert out_f32.shape == (B, out_channels, L_out), out_f32.shape

    tol = 5e-2 * float(scale) + 1e-4   # bf16 inputs / DEFAULT-precision MXU passes
    err16 = float(jnp.max(jnp.abs(out_bf16 - ref)))
    err32 = float(jnp.max(jnp.abs(out_f32 - ref)))
    assert err16 <= tol, f"bf16 path mismatch vs reference: {err16} > {tol}"
    assert err32 <= tol, f"f32 path mismatch vs reference: {err32} > {tol}"
    print("KERNEL_OK")
</pallas_src>

<mosaic_0001>
module attributes {stable_mosaic.version = 11 : i64} {
  func.func @kernel(%arg0: i32, %arg1: i32, %arg2: memref<1x1x128xbf16, #tpu.memory_space<vmem>>, %arg3: memref<1x1x128xbf16, #tpu.memory_space<vmem>>, %arg4: memref<8x16xbf16, #tpu.memory_space<vmem>>, %arg5: memref<1x8x128xf32, #tpu.memory_space<vmem>>, %arg6: memref<16x256xbf16, #tpu.memory_space<vmem>>, %arg7: memref<16x128xbf16, #tpu.memory_space<vmem>>) attributes {dimension_semantics = [#tpu.dimension_semantics<parallel>, #tpu.dimension_semantics<parallel>], iteration_bounds = array<i64: 1, 2>, scalar_prefetch = 0 : i64, scratch_operands = 2 : i64, tpu.core_type = #tpu.core_type<tc>, window_params = [{transform_indices = @transform_0, window_bounds = array<i64: 1, 1, 128>}, {transform_indices = @transform_1, window_bounds = array<i64: 1, 1, 128>}, {pipeline_mode = #tpu.pipeline_mode<synchronous>, transform_indices = @transform_2, window_bounds = array<i64: 8, 16>}, {transform_indices = @transform_3, window_bounds = array<i64: 1, 8, 128>}]} {
    %c0 = arith.constant 0 : index
    %c0_0 = arith.constant 0 : index
    %c0_1 = arith.constant 0 : index
    %0 = vector.load %arg2[%c0, %c0_0, %c0_1] : memref<1x1x128xbf16, #tpu.memory_space<vmem>>, vector<1x1x128xbf16>
    %1 = vector.shape_cast %0 : vector<1x1x128xbf16> to vector<1x128xbf16>
    %c0_2 = arith.constant 0 : index
    %c0_3 = arith.constant 0 : index
    %2 = vector.load %arg6[%c0_2, %c0_3] : memref<16x256xbf16, #tpu.memory_space<vmem>>, vector<1x128xbf16>
    tpu.vector_store %arg6[%c0_2, %c0_3], %1 {strides = array<i32>} : memref<16x256xbf16, #tpu.memory_space<vmem>>, vector<1x128xbf16>,
    %c0_4 = arith.constant 0 : index
    %c0_5 = arith.constant 0 : index
    %c0_6 = arith.constant 0 : index
    %3 = vector.load %arg3[%c0_4, %c0_5, %c0_6] : memref<1x1x128xbf16, #tpu.memory_space<vmem>>, vector<1x1x128xbf16>
    %4 = vector.shape_cast %3 : vector<1x1x128xbf16> to vector<1x128xbf16>
    %c0_7 = arith.constant 0 : index
    %c128 = arith.constant 128 : index
    %5 = vector.load %arg6[%c0_7, %c128] : memref<16x256xbf16, #tpu.memory_space<vmem>>, vector<1x128xbf16>
    tpu.vector_store %arg6[%c0_7, %c128], %4 {strides = array<i32>} : memref<16x256xbf16, #tpu.memory_space<vmem>>, vector<1x128xbf16>,
    %c0_8 = arith.constant 0 : index
    %c1 = arith.constant 1 : index
    %6 = vector.load %arg6[%c0_8, %c1] : memref<16x256xbf16, #tpu.memory_space<vmem>>, vector<1x255xbf16>
    %c1_9 = arith.constant 1 : index
    %c0_10 = arith.constant 0 : index
    %7 = vector.load %arg6[%c1_9, %c0_10] : memref<16x256xbf16, #tpu.memory_space<vmem>>, vector<1x255xbf16>
    tpu.vector_store %arg6[%c1_9, %c0_10], %6 {strides = array<i32>} : memref<16x256xbf16, #tpu.memory_space<vmem>>, vector<1x255xbf16>,
    %c0_11 = arith.constant 0 : index
    %c2 = arith.constant 2 : index
    %8 = vector.load %arg6[%c0_11, %c2] : memref<16x256xbf16, #tpu.memory_space<vmem>>, vector<1x254xbf16>
    %c2_12 = arith.constant 2 : index
    %c0_13 = arith.constant 0 : index
    %9 = vector.load %arg6[%c2_12, %c0_13] : memref<16x256xbf16, #tpu.memory_space<vmem>>, vector<1x254xbf16>
    tpu.vector_store %arg6[%c2_12, %c0_13], %8 {strides = array<i32>} : memref<16x256xbf16, #tpu.memory_space<vmem>>, vector<1x254xbf16>,
    %c0_14 = arith.constant 0 : index
    %c3 = arith.constant 3 : index
    %10 = vector.load %arg6[%c0_14, %c3] : memref<16x256xbf16, #tpu.memory_space<vmem>>, vector<1x253xbf16>
    %c3_15 = arith.constant 3 : index
    %c0_16 = arith.constant 0 : index
    %11 = vector.load %arg6[%c3_15, %c0_16] : memref<16x256xbf16, #tpu.memory_space<vmem>>, vector<1x253xbf16>
    tpu.vector_store %arg6[%c3_15, %c0_16], %10 {strides = array<i32>} : memref<16x256xbf16, #tpu.memory_space<vmem>>, vector<1x253xbf16>,
    %c0_17 = arith.constant 0 : index
    %c4 = arith.constant 4 : index
    %12 = vector.load %arg6[%c0_17, %c4] : memref<16x256xbf16, #tpu.memory_space<vmem>>, vector<1x252xbf16>
    %c4_18 = arith.constant 4 : index
    %c0_19 = arith.constant 0 : index
    %13 = vector.load %arg6[%c4_18, %c0_19] : memref<16x256xbf16, #tpu.memory_space<vmem>>, vector<1x252xbf16>
    tpu.vector_store %arg6[%c4_18, %c0_19], %12 {strides = array<i32>} : memref<16x256xbf16, #tpu.memory_space<vmem>>, vector<1x252xbf16>,
    %c0_20 = arith.constant 0 : index
    %c5 = arith.constant 5 : index
    %14 = vector.load %arg6[%c0_20, %c5] : memref<16x256xbf16, #tpu.memory_space<vmem>>, vector<1x251xbf16>
    %c5_21 = arith.constant 5 : index
    %c0_22 = arith.constant 0 : index
    %15 = vector.load %arg6[%c5_21, %c0_22] : memref<16x256xbf16, #tpu.memory_space<vmem>>, vector<1x251xbf16>
    tpu.vector_store %arg6[%c5_21, %c0_22], %14 {strides = array<i32>} : memref<16x256xbf16, #tpu.memory_space<vmem>>, vector<1x251xbf16>,
    %c0_23 = arith.constant 0 : index
    %c6 = arith.constant 6 : index
    %16 = vector.load %arg6[%c0_23, %c6] : memref<16x256xbf16, #tpu.memory_space<vmem>>, vector<1x250xbf16>
    %c6_24 = arith.constant 6 : index
    %c0_25 = arith.constant 0 : index
    %17 = vector.load %arg6[%c6_24, %c0_25] : memref<16x256xbf16, #tpu.memory_space<vmem>>, vector<1x250xbf16>
    tpu.vector_store %arg6[%c6_24, %c0_25], %16 {strides = array<i32>} : memref<16x256xbf16, #tpu.memory_space<vmem>>, vector<1x250xbf16>,
    %c0_26 = arith.constant 0 : index
    %c7 = arith.constant 7 : index
    %18 = vector.load %arg6[%c0_26, %c7] : memref<16x256xbf16, #tpu.memory_space<vmem>>, vector<1x249xbf16>
    %c7_27 = arith.constant 7 : index
    %c0_28 = arith.constant 0 : index
    %19 = vector.load %arg6[%c7_27, %c0_28] : memref<16x256xbf16, #tpu.memory_space<vmem>>, vector<1x249xbf16>
    tpu.vector_store %arg6[%c7_27, %c0_28], %18 {strides = array<i32>} : memref<16x256xbf16, #tpu.memory_space<vmem>>, vector<1x249xbf16>,
    %c0_29 = arith.constant 0 : index
    %c8 = arith.constant 8 : index
    %20 = vector.load %arg6[%c0_29, %c8] : memref<16x256xbf16, #tpu.memory_space<vmem>>, vector<1x248xbf16>
    %c8_30 = arith.constant 8 : index
    %c0_31 = arith.constant 0 : index
    %21 = vector.load %arg6[%c8_30, %c0_31] : memref<16x256xbf16, #tpu.memory_space<vmem>>, vector<1x248xbf16>
    tpu.vector_store %arg6[%c8_30, %c0_31], %20 {strides = array<i32>} : memref<16x256xbf16, #tpu.memory_space<vmem>>, vector<1x248xbf16>,
    %c0_32 = arith.constant 0 : index
    %c9 = arith.constant 9 : index
    %22 = vector.load %arg6[%c0_32, %c9] : memref<16x256xbf16, #tpu.memory_space<vmem>>, vector<1x247xbf16>
    %c9_33 = arith.constant 9 : index
    %c0_34 = arith.constant 0 : index
    %23 = vector.load %arg6[%c9_33, %c0_34] : memref<16x256xbf16, #tpu.memory_space<vmem>>, vector<1x247xbf16>
    tpu.vector_store %arg6[%c9_33, %c0_34], %22 {strides = array<i32>} : memref<16x256xbf16, #tpu.memory_space<vmem>>, vector<1x247xbf16>,
    %c0_35 = arith.constant 0 : index
    %c10 = arith.constant 10 : index
    %24 = vector.load %arg6[%c0_35, %c10] : memref<16x256xbf16, #tpu.memory_space<vmem>>, vector<1x246xbf16>
    %c10_36 = arith.constant 10 : index
    %c0_37 = arith.constant 0 : index
    %25 = vector.load %arg6[%c10_36, %c0_37] : memref<16x256xbf16, #tpu.memory_space<vmem>>, vector<1x246xbf16>
    tpu.vector_store %arg6[%c10_36, %c0_37], %24 {strides = array<i32>} : memref<16x256xbf16, #tpu.memory_space<vmem>>, vector<1x246xbf16>,
    %c0_38 = arith.constant 0 : index
    %c11 = arith.constant 11 : index
    %26 = vector.load %arg6[%c0_38, %c11] : memref<16x256xbf16, #tpu.memory_space<vmem>>, vector<1x245xbf16>
    %c11_39 = arith.constant 11 : index
    %c0_40 = arith.constant 0 : index
    %27 = vector.load %arg6[%c11_39, %c0_40] : memref<16x256xbf16, #tpu.memory_space<vmem>>, vector<1x245xbf16>
    tpu.vector_store %arg6[%c11_39, %c0_40], %26 {strides = array<i32>} : memref<16x256xbf16, #tpu.memory_space<vmem>>, vector<1x245xbf16>,
    %c0_41 = arith.constant 0 : index
    %c12 = arith.constant 12 : index
    %28 = vector.load %arg6[%c0_41, %c12] : memref<16x256xbf16, #tpu.memory_space<vmem>>, vector<1x244xbf16>
    %c12_42 = arith.constant 12 : index
    %c0_43 = arith.constant 0 : index
    %29 = vector.load %arg6[%c12_42, %c0_43] : memref<16x256xbf16, #tpu.memory_space<vmem>>, vector<1x244xbf16>
    tpu.vector_store %arg6[%c12_42, %c0_43], %28 {strides = array<i32>} : memref<16x256xbf16, #tpu.memory_space<vmem>>, vector<1x244xbf16>,
    %c0_44 = arith.constant 0 : index
    %c13 = arith.constant 13 : index
    %30 = vector.load %arg6[%c0_44, %c13] : memref<16x256xbf16, #tpu.memory_space<vmem>>, vector<1x243xbf16>
    %c13_45 = arith.constant 13 : index
    %c0_46 = arith.constant 0 : index
    %31 = vector.load %arg6[%c13_45, %c0_46] : memref<16x256xbf16, #tpu.memory_space<vmem>>, vector<1x243xbf16>
    tpu.vector_store %arg6[%c13_45, %c0_46], %30 {strides = array<i32>} : memref<16x256xbf16, #tpu.memory_space<vmem>>, vector<1x243xbf16>,
    %c0_47 = arith.constant 0 : index
    %c14 = arith.constant 14 : index
    %32 = vector.load %arg6[%c0_47, %c14] : memref<16x256xbf16, #tpu.memory_space<vmem>>, vector<1x242xbf16>
    %c14_48 = arith.constant 14 : index
    %c0_49 = arith.constant 0 : index
    %33 = vector.load %arg6[%c14_48, %c0_49] : memref<16x256xbf16, #tpu.memory_space<vmem>>, vector<1x242xbf16>
    tpu.vector_store %arg6[%c14_48, %c0_49], %32 {strides = array<i32>} : memref<16x256xbf16, #tpu.memory_space<vmem>>, vector<1x242xbf16>,
    %c0_50 = arith.constant 0 : index
    %c15 = arith.constant 15 : index
    %34 = vector.load %arg6[%c0_50, %c15] : memref<16x256xbf16, #tpu.memory_space<vmem>>, vector<1x241xbf16>
    %c15_51 = arith.constant 15 : index
    %c0_52 = arith.constant 0 : index
    %35 = vector.load %arg6[%c15_51, %c0_52] : memref<16x256xbf16, #tpu.memory_space<vmem>>, vector<1x241xbf16>
    tpu.vector_store %arg6[%c15_51, %c0_52], %34 {strides = array<i32>} : memref<16x256xbf16, #tpu.memory_space<vmem>>, vector<1x241xbf16>,
    %c0_53 = arith.constant 0 : index
    %c0_54 = arith.constant 0 : index
    %36 = vector.load %arg6[%c0_53, %c0_54] : memref<16x256xbf16, #tpu.memory_space<vmem>>, vector<16x128xbf16>
    %c0_55 = arith.constant 0 : index
    %c0_56 = arith.constant 0 : index
    %37 = vector.load %arg7[%c0_55, %c0_56] : memref<16x128xbf16, #tpu.memory_space<vmem>>, vector<16x128xbf16>
    tpu.vector_store %arg7[%c0_55, %c0_56], %36 {strides = array<i32>} : memref<16x128xbf16, #tpu.memory_space<vmem>>, vector<16x128xbf16>,
    %c0_57 = arith.constant 0 : index
    %c0_58 = arith.constant 0 : index
    %38 = vector.load %arg4[%c0_57, %c0_58] : memref<8x16xbf16, #tpu.memory_space<vmem>>, vector<8x16xbf16>
    %c0_59 = arith.constant 0 : index
    %c0_60 = arith.constant 0 : index
    %39 = vector.load %arg7[%c0_59, %c0_60] : memref<16x128xbf16, #tpu.memory_space<vmem>>, vector<16x128xbf16>
    %cst = arith.constant dense<0.000000e+00> : vector<8x128xf32>
    %40 = tpu.matmul %38, %39, %cst {dimension_numbers = #tpu.dot_dimension_numbers<[1], [0], [0], [1], [0, 0, 1, 1], [], []>} : vector<8x16xbf16>, vector<16x128xbf16>, vector<8x128xf32> -> vector<8x128xf32>
    %c0_61 = arith.constant 0 : index
    %c0_62 = arith.constant 0 : index
    %c0_63 = arith.constant 0 : index
    %41 = vector.load %arg5[%c0_61, %c0_62, %c0_63] : memref<1x8x128xf32, #tpu.memory_space<vmem>>, vector<1x8x128xf32>
    %42 = vector.shape_cast %41 : vector<1x8x128xf32> to vector<8x128xf32>
    %43 = vector.shape_cast %40 : vector<8x128xf32> to vector<1x8x128xf32>
    tpu.vector_store %arg5[%c0_61, %c0_62, %c0_63], %43 {strides = array<i32>} : memref<1x8x128xf32, #tpu.memory_space<vmem>>, vector<1x8x128xf32>,
    return
  }
  func.func @transform_0(%arg0: i32, %arg1: i32) -> (i32, i32, i32) {
    %c0_i32 = arith.constant 0 : i32
    %c0_i32_0 = arith.constant 0 : i32
    return %arg1, %c0_i32, %arg0 : i32, i32, i32
  }
  func.func @transform_1(%arg0: i32, %arg1: i32) -> (i32, i32, i32) {
    %c1_i32 = arith.constant 1 : i32
    %0 = arith.addi %arg0, %c1_i32 : i32
    %c0_i32 = arith.constant 0 : i32
    %c0_i32_0 = arith.constant 0 : i32
    return %arg1, %c0_i32, %0 : i32, i32, i32
  }
  func.func @transform_2(%arg0: i32, %arg1: i32) -> (i32, i32) {
    %c0_i32 = arith.constant 0 : i32
    %c0_i32_0 = arith.constant 0 : i32
    %c0_i32_1 = arith.constant 0 : i32
    return %c0_i32, %c0_i32_0 : i32, i32
  }
  func.func @transform_3(%arg0: i32, %arg1: i32) -> (i32, i32, i32) {
    %c0_i32 = arith.constant 0 : i32
    %c0_i32_0 = arith.constant 0 : i32
    return %arg1, %c0_i32, %arg0 : i32, i32, i32
  }
}

</mosaic_0001>

<bundles_post_ra>
// kernel: tpu_custom_call.1
= control target key start
LH: loop header
LB: loop body
LE: loop exit
PB: predicated region body
PF: predicated region fallthrough
CT: control target
= control target key end

     0   :  { %8 = vsyncpa [#allocation5], 0  ;;  %s1328_s0 = inlined_call_operand.vmem [shape: bf16[2,1,256], index: 0, kind: input, shape index: {}]   ;;  %s1329_s1 = inlined_call_operand.vmem [shape: bf16[2,1,256], index: 1, kind: input, shape index: {}]   ;;  %s1330_s2 = inlined_call_operand.vmem [shape: bf16[8,16], index: 2, kind: input, shape index: {}]   ;;  %s1331_s3 = inlined_call_operand.hbm [shape: f32[2,8,120], index: 3, kind: output, shape index: {}]  }
   0x1   :  { %10 = vsyncpa [#allocation5 + $0x1], 0  ;;  %s1035_s12 = smov 0   ;;  %s1037_s13 = smov 0  }
   0x2   :  { %s1039_s14 = smov 0   ;;  %s1041_s15 = smov 0  }
   0x3   :  { %s1043_s16 = smov 0   ;;  %s1045_s17 = smov 0  }
   0x4 LB: > { %s784_s18 = sadd.s32 4294967295, %s995_s17   ;;  %s785_s19 = sadd.s32 4294967294, %s995_s17   ;;  %s995_s17 = sphi %s1045_s17, %s16_s17   ;;  %s991_s16 = sphi %s1043_s16, %s1388_s16   ;;  %s987_s15 = sphi %s1041_s15, %s1387_s15   ;;  %s983_s14 = sphi %s1039_s14, %s1386_s14   ;;  %s979_s13 = sphi %s1037_s13, %s1385_s13   ;;  %s975_s12 = sphi %s1035_s12, %s1384_s12  }
   0x5   : > { %s25_s20 = sadd.s32 1, %s991_s16  ;;  %s116_s21 = sadd.s32 1, %s983_s14 }
   0x6   : > { %p26_p0 = scmp.ge.s32.totalorder %s25_s20, 2  ;;  %p126_p1 = scmp.ne.s32.totalorder %s983_s14, %s979_s13 }
   0x7   : > { %p127_p2 = scmp.eq.s32.totalorder %s784_s18, 1  ;;  %p132_p3 = scmp.ne.s32.totalorder %s979_s13, %s975_s12 }
   0x8   : > { %s1390_s20 = smov (%p26_p0, %s25_s20), 0  ;;  %p133_p5 = scmp.eq.s32.totalorder %s785_s19, 1 }
   0x9   : > { %p1075_p4 = por %p127_p2, %p126_p1  ;;  %s111_s23 = ssub.s32 %s991_s16, %s1390_s20 }
   0xa   : > { %p788_p6 = scmp.ge.s32.totalorder %s995_s17, 1  ;;  %p114_p7 = scmp.eq.s32.totalorder %s111_s23, 0 }
   0xb   : > { %p1082_p8 = por %p133_p5, %p132_p3  ;;  %p176_p9 = scmp.lt.s32.totalorder %s995_s17, 3 }
   0xc   : > { %s1088_s25 = scalar_select %p114_p7, %s983_s14, %s116_s21  }
   0xd   : > { %p177_p10 = pnand %p788_p6, %p176_p9 }
   0xe   : > { %p210_p11 = scmp.lt.s32.totalorder (!%p177_p10), %s987_s15, 1  ;;  %vm228_vm0 = vcmask (!%p177_p10), 1040384   ;;  %vm229_vm1 = vsmask.f32 (!%p177_p10), 256  ;;  %v231_v0 = vld [vmem:[#allocation2] sm:$0x1] (!%p177_p10) }
   0xf   : > { %180 = sbr.rel (%p177_p10) target bundleno = 567 (0x237), region = 32  ;;  %vm230_vm2 = vmand (!%p177_p10), %vm228_vm0, %vm229_vm1  ;;  %v235_v1 = vld [vmem:[#allocation2 + $0x8] sm:$0x1] (!%p177_p10)  ;;  %s997_s8 = smov (!%p177_p10), 127   ;;  %vm254_vm3 = vsmask.f32 (!%p177_p10), 7938 }
  0x10   : > { %vm258_vm4 = vcmask (!%p177_p10), 1032192   ;;  %vm250_vm5 = vcmask (!%p177_p10), 1039360   ;;  %vm255_vm7 = vmand (!%p177_p10), %vm228_vm0, %vm254_vm3  ;;  %s998_s9 = smov (!%p177_p10), 124   ;;  %s999_s10 = smov (!%p177_p10), 126   ;;  %vm1013_vm8 = vmmov (!%p177_p10), 0   ;;  %vm336_vm10 = vcmask (!%p177_p10), 1009666  }
  0x11   : > { %vm259_vm6 = vmand (!%p177_p10), %vm258_vm4, %vm254_vm3  ;;  %s1000_s11 = smov (!%p177_p10), 122   ;;  %s1001_s18 = smov (!%p177_p10), 120   ;;  %vm331_vm9 = vsmask.f32 (!%p177_p10), 2304  ;;  %vm278_vm11 = vsmask.f32 (!%p177_p10), 1280 }
  0x12   : > { %s1002_s19 = smov (!%p177_p10), 118   ;;  %s1003_s21 = smov (!%p177_p10), 116   ;;  %vm283_vm12 = vcmask (!%p177_p10), 1025025   ;;  %vm337_vm13 = vmand (!%p177_p10), %vm336_vm10, %vm331_vm9  ;;  %vm384_vm15 = vsmask.f32 (!%p177_p10), 3328  ;;  %vm389_vm0 = vcmask (!%p177_p10), 994307  }
  0x13   : > { %s1004_s23 = smov (!%p177_p10), 114   ;;  %s1007_s28 = smov (!%p177_p10), 121   ;;  %vm284_vm14 = vmand (!%p177_p10), %vm283_vm12, %vm278_vm11  ;;  %vm330_vm1 = vcmask (!%p177_p10), 1042434   ;;  %vm326_vm3 = vcmask (!%p177_p10), 1014784   ;;  %vm379_vm10 = vcmask (!%p177_p10), 998400  }
  0x14   : > { %s1008_s29 = smov (!%p177_p10), 119   ;;  %s1012_s5 = smov (!%p177_p10), 113   ;;  %vm1110_vm4 = vmand (!%p177_p10), %vm330_vm1, %vm331_vm9  ;;  %vm490_vm12 = vsmask.f32 (!%p177_p10), 5376 }
  0x16   : > { %s211_s26 = scalar_select %p210_p11, %s987_s15, 1 }
  0x18   : > { %s790_s27 = sshll.u32 %s211_s26, 1  ;;  %s1005_s26 = smov 125  }
  0x19   : > { %s216_s30 = scalar_lea.vmem %s1328_s0, %s790_s27  ;;  %s223_s4 = sadd.s32 1, %s790_s27 }
  0x1a   : > { %s224_s7 = scalar_lea.vmem %s1329_s1, %s223_s4  ;;  %v227_v2 = vld [vmem:[%s216_s30] sm:$0x1]  ;;  %s1006_s27 = smov 123  }
  0x1b   : > { %v232_v3 = vsel %vm230_vm2, %v227_v2, %v231_v0  ;;  %v234_v4 = vld [vmem:[%s224_s7] sm:$0x1]  ;;  %s1010_s30 = smov 117   ;;  %s1011_s4 = smov 115  }
  0x1c   : > { %233 = vst [vmem:[#allocation2] sm:$0x1] %v232_v3  ;;  %v236_v5 = vsel %vm230_vm2, %v234_v4, %v235_v1  ;;  %vm390_vm2 = vmand %vm389_vm0, %vm384_vm15 }
  0x1d   : > { %237 = vst [vmem:[#allocation2 + $0x8] sm:$0x1] %v236_v5 }
  0x23   : > { %v238_v6 = vld [vmem:[#allocation2] sm:$0x1] }
  0x24   : > { %v239_v7 = vld [vmem:[#allocation2 + $0x8] sm:$0x1]  ;;  %v241_v8 = vshll.u32 %v238_v6, 16 }
  0x25   : > { %v244_v9 = vshll.u32 %v239_v7, 16  ;;  %v260_v11 = vld [vmem:[#allocation2 + $0x8] sm:$0x1] }
  0x27   : > { %v877_v10 = vpack.i.bf16 %v244_v9, %v241_v8 }
  0x29   : > { %878 = vrot.lane.b32.xlu0 %v877_v10, %s997_s8  ;;  %s207_s8 = sand.u32 1, %s979_s13  }
  0x9b   : > { %v879_v12 = vpop.permute.xlu0 %878 }
  0x9c   : > { %v881_v13 = vunpack.i.h.bf16 %v879_v12  ;;  %v880_v14 = vunpack.i.l.bf16 %v879_v12 }
  0x9e   : > { %v261_v15 = vsel %vm259_vm6, %v881_v13, %v260_v11  ;;  %v251_v16 = vsel %vm250_vm5, %v880_v14, %v881_v13  ;;  %vm437_vm5 = vsmask.f32 4352  ;;  %vm442_vm6 = vcmask 978948  }
  0x9f   : > { %262 = vst [vmem:[#allocation2 + $0x8] sm:$0x1] %v261_v15  ;;  %v256_v17 = vsel %vm255_vm7, %v251_v16, %v238_v6  ;;  %vm383_vm7 = vcmask 1043459  }
  0xa0   : > { %257 = vst [vmem:[#allocation2] sm:$0x1] %v256_v17  ;;  %vm1119_vm9 = vmand %vm383_vm7, %vm384_vm15  ;;  %vm432_vm15 = vcmask 982016  }
  0xa6   : > { %v317_v18 = vld [vmem:[#allocation2 + $0x8] sm:$0x1] }
  0xa7   : > { %v264_v19 = vld [vmem:[#allocation2 + $0x8] sm:$0x1]  ;;  %v321_v20 = vrot.slane %v317_v18, 6  ;;  %v316_v23 = vld [vmem:[#allocation2] sm:$0x1] }
  0xa8   : > { %v268_v21 = vrot.slane %v264_v19, 7  ;;  %v370_v22 = vld [vmem:[#allocation2 + $0x8] sm:$0x1]  ;;  %v320_v25 = vrot.slane %v316_v23, 6  ;;  %v369_v27 = vld [vmem:[#allocation2] sm:$0x1] }
  0xa9   : > { %324 = vrot.lane.b32.xlu0 %v321_v20, %s998_s9  ;;  %v374_v24 = vrot.slane %v370_v22, 5  ;;  %v423_v26 = vld [vmem:[#allocation2 + $0x8] sm:$0x1]  ;;  %v373_v29 = vrot.slane %v369_v27, 5  ;;  %v422_v31 = vld [vmem:[#allocation2] sm:$0x1] }
  0xaa   : > { %271 = vrot.lane.b32.xlu1 %v268_v21, %s999_s10  ;;  %v427_v28 = vrot.slane %v423_v26, 4  ;;  %v476_v30 = vld [vmem:[#allocation2 + $0x8] sm:$0x1]  ;;  %v426_v33 = vrot.slane %v422_v31, 4  ;;  %v475_v35 = vld [vmem:[#allocation2] sm:$0x1] }
  0xab   : > { %v480_v32 = vrot.slane %v476_v30, 3  ;;  %v529_v34 = vld [vmem:[#allocation2 + $0x8] sm:$0x1]  ;;  %v528_v37 = vld [vmem:[#allocation2] sm:$0x1]  ;;  %v479_v39 = vrot.slane %v475_v35, 3 }
  0xac   : > { %v582_v36 = vld [vmem:[#allocation2 + $0x8] sm:$0x1]  ;;  %v533_v38 = vrot.slane %v529_v34, 2  ;;  %v288_v40 = vld [vmem:[#allocation2] sm:$0x1]  ;;  %v532_v45 = vrot.slane %v528_v37, 2 }
  0xad   : > { %377 = vrot.lane.b32.xlu0 %v374_v24, %s1000_s11  ;;  %v289_v41 = vld [vmem:[#allocation2 + $0x8] sm:$0x1]  ;;  %v341_v42 = vld [vmem:[#allocation2] sm:$0x1]  ;;  %v586_v44 = vrot.slane %v582_v36, 1  ;;  %v291_v48 = vshll.u32 %v288_v40, 16 }
  0xae   : > { %322 = vrot.lane.b32.xlu1 %v320_v25, %s998_s9  ;;  %v342_v43 = vld [vmem:[#allocation2 + $0x8] sm:$0x1]  ;;  %v581_v46 = vld [vmem:[#allocation2] sm:$0x1]  ;;  %v295_v49 = vshll.u32 %v289_v41, 16  ;;  %v344_v52 = vshll.u32 %v341_v42, 16 }
  0xaf   : > { %v263_v47 = vld [vmem:[#allocation2] sm:$0x1]  ;;  %v395_v51 = vld [vmem:[#allocation2 + $0x8] sm:$0x1]  ;;  %v348_v53 = vshll.u32 %v342_v43, 16  ;;  %v585_v56 = vrot.slane %v581_v46, 1 }
  0xb0   : > { %v394_v50 = vld [vmem:[#allocation2] sm:$0x1]  ;;  %v448_v55 = vld [vmem:[#allocation2 + $0x8] sm:$0x1]  ;;  %v267_v57 = vrot.slane %v263_v47, 7  ;;  %v401_v59 = vshll.u32 %v395_v51, 16 }
  0xb1   : > { %430 = vrot.lane.b32.xlu0 %v427_v28, %s1001_s18  ;;  %v447_v54 = vld [vmem:[#allocation2] sm:$0x1]  ;;  %v397_v58 = vshll.u32 %v394_v50, 16  ;;  %v293_v60 = vrot.slane %v291_v48, 7  ;;  %v297_v61 = vrot.slane %v295_v49, 7  ;;  %v454_v63 = vshll.u32 %v448_v55, 16 }
  0xb2   : > { %375 = vrot.lane.b32.xlu1 %v373_v29, %s1000_s11  ;;  %v450_v62 = vshll.u32 %v447_v54, 16  ;;  %v346_v0 = vrot.slane %v344_v52, 6  ;;  %v350_v1 = vrot.slane %v348_v53, 6  ;;  %v500_v2 = vld [vmem:[#allocation2] sm:$0x1]  ;;  %v403_v7 = vrot.slane %v401_v59, 5 }
  0xb3   : > { %v501_v3 = vld [vmem:[#allocation2 + $0x8] sm:$0x1]  ;;  %v553_v4 = vld [vmem:[#allocation2] sm:$0x1]  ;;  %v399_v6 = vrot.slane %v397_v58, 5  ;;  %v456_v9 = vrot.slane %v454_v63, 4  ;;  %v882_v12 = vpack.i.bf16 %v297_v61, %v293_v60 }
  0xb4   : > { %v554_v5 = vld [vmem:[#allocation2 + $0x8] sm:$0x1]  ;;  %v452_v8 = vrot.slane %v450_v62, 4  ;;  %v503_v10 = vshll.u32 %v500_v2, 16  ;;  %v507_v11 = vshll.u32 %v501_v3, 16  ;;  %v887_v13 = vpack.i.bf16 %v350_v1, %v346_v0  ;;  %s789_s9 = sshll.u32 %s207_s8, 3 }
  0xb5   : > { %483 = vrot.lane.b32.xlu0 %v480_v32, %s1002_s19  ;;  %v556_v14 = vshll.u32 %v553_v4, 16  ;;  %v560_v15 = vshll.u32 %v554_v5, 16  ;;  %v606_v16 = vld [vmem:[#allocation2] sm:$0x1]  ;;  %v607_v17 = vld [vmem:[#allocation2 + $0x8] sm:$0x1]  ;;  %v892_v18 = vpack.i.bf16 %v403_v7, %v399_v6 }
  0xb6   : > { %428 = vrot.lane.b32.xlu1 %v426_v33, %s1001_s18  ;;  %v897_v19 = vpack.i.bf16 %v456_v9, %v452_v8  ;;  %v505_v20 = vrot.slane %v503_v10, 3  ;;  %v509_v21 = vrot.slane %v507_v11, 3  ;;  %v609_v24 = vshll.u32 %v606_v16, 16  ;;  %v338_v32 = vld [vmem:[#allocation2 + $0x8] sm:$0x4]  ;;  %s794_s18 = sshll.u32 %s987_s15, 7 }
  0xb7   : > { %v558_v22 = vrot.slane %v556_v14, 2  ;;  %v562_v23 = vrot.slane %v560_v15, 2  ;;  %v613_v25 = vshll.u32 %v607_v17, 16  ;;  %v1009_v26 = vmov 0.0   ;;  %v285_v33 = vld [vmem:[#allocation2 + $0x8] sm:$0x2] }
  0xb8   : > { %799 = vmatprep.subr.bf16.mxu0 %v1009_v26  ;;  %v902_v27 = vpack.i.bf16 %v509_v21, %v505_v20  ;;  %v611_v29 = vrot.slane %v609_v24, 1  ;;  %801 = vmatprep.mubr.msk.bf16.mxu0 %vm1013_vm8, %v1009_v26  ;;  %v333_v40 = vld [vmem:[#allocation2] sm:$0x4]  ;;  %vm443_vm8 = vmand %vm442_vm6, %vm437_vm5  ;;  %v444_v46 = vld [vmem:[#allocation2 + $0x8] sm:$0x10]  ;;  %vm1332_vm6 = vcmask 1045509  }
  0xb9   : > { %536 = vrot.lane.b32.xlu0 %v533_v38, %s1003_s21  ;;  %v907_v28 = vpack.i.bf16 %v562_v23, %v558_v22  ;;  %v615_v30 = vrot.slane %v613_v25, 1  ;;  %v391_v38 = vld [vmem:[#allocation2 + $0x8] sm:$0x8]  ;;  %v386_v48 = vld [vmem:[#allocation2] sm:$0x8]  ;;  %s1014_s15 = smov [#allocation4]  }
  0xba   : > { %481 = vrot.lane.b32.xlu1 %v479_v39, %s1002_s19  ;;  %v497_v54 = vld [vmem:[#allocation2 + $0x8] sm:$0x20]  ;;  %v550_v62 = vld [vmem:[#allocation2 + $0x8] sm:$0x40]  ;;  %v492_v0 = vld [vmem:[#allocation2] sm:$0x20] }
  0xbb   : > { %v912_v31 = vpack.i.bf16 %v615_v30, %v611_v29  ;;  %v603_v6 = vld [vmem:[#allocation2 + $0x8] sm:$0x80]  ;;  %v545_v8 = vld [vmem:[#allocation2] sm:$0x40]  ;;  %v598_v16 = vld [vmem:[#allocation2] sm:$0x80] }
  0xbc   : > { %v280_v17 = vld [vmem:[#allocation2] sm:$0x2] }
  0xbd   : > { %589 = vrot.lane.b32.xlu0 %v586_v44, %s1004_s23  ;;  %v636_v29 = vld [vmem:[%s1330_s2] sm:$0xf] }
  0xbe   : > { %534 = vrot.lane.b32.xlu1 %v532_v45, %s1003_s21 }
  0xc1   : > { %269 = vrot.lane.b32.xlu0 %v267_v57, %s999_s10  ;;  %s209_s10 = scalar_lea.vmem [#allocation4], %s789_s9 }
  0xc2   : > { %587 = vrot.lane.b32.xlu1 %v585_v56, %s1004_s23  ;;  %v439_v56 = vld [vmem:[#allocation2] sm:$0x10]  ;;  %s698_s11 = sshll.u32 %s209_s10, 4  ;;  %s1283_s23 = scalar_lea.hbm %s1331_s3, %s794_s18  ;;  %s1278_s11 = int_to_ptr.vmem [resolvable:$true] %s698_s11 }
  0xc5   : > { %888 = vrot.lane.b32.xlu0 %v887_v13, %s1006_s27  ;;  %s917_s27 = scalar_lea.vmem %s1278_s11, 128 }
  0xc6   : > { %883 = vrot.lane.b32.xlu1 %v882_v12, %s1005_s26  ;;  %s684_s26 = scalar_lea.sflag [#allocation5], %s207_s8  ;;  %p918_p12 = scmp.ne.s32.totalorder %s1278_s11, %s917_s27 }
  0xc8   : > { %p919_p13 = pnand %p918_p12, %p1075_p4 }
  0xc9   : > { %898 = vrot.lane.b32.xlu0 %v897_v19, %s1008_s29 }
  0xca   : > { %893 = vrot.lane.b32.xlu1 %v892_v18, %s1007_s28  ;;  %p920_p0 = pneg %p919_p13  ;;  %s921_s28 = sshll.u32 %s1014_s15, 4  ;;  %s922_s28 = int_to_ptr.vmem [resolvable:$false] %s921_s28 }
  0xcb   : > { %s923_s29 = scalar_lea.vmem %s922_s28, 256  ;;  %p924_p1 = scmp.lt.s32.totalorder %s1278_s11, %s922_s28 }
  0xcc   : > { %p925_p2 = scmp.lt.s32.totalorder %s923_s29, %s917_s27 }
  0xcd   : > { %908 = vrot.lane.b32.xlu0 %v907_v28, %s1011_s4 }
  0xce   : > { %903 = vrot.lane.b32.xlu1 %v902_v27, %s1010_s30  ;;  %p926_p3 = por %p925_p2, %p924_p1 }
  0xd0   : > { %p927_p5 = pnand %p926_p3, %p920_p0 }
  0xd2   : > { %913 = vrot.lane.b32.xlu1 %v912_v31, %s1012_s5 }
 0x11b   : > { %v325_v34 = vpop.permute.xlu0 %324 }
 0x11c   : > { %v1104_v35 = vpop.permute.xlu1 %271  ;;  %v339_v36 = vsel %vm337_vm13, %v325_v34, %v338_v32  ;;  %vm495_vm13 = vcmask 963589  }
 0x11d   : > { %v286_v37 = vsel %vm284_vm14, %v1104_v35, %v285_v33  ;;  %340 = vst [vmem:[#allocation2 + $0x8] sm:$0x4] %v339_v36  ;;  %vm1335_vm14 = vcmask 1044484   ;;  %vm496_vm0 = vmand %vm495_vm13, %vm490_vm12  ;;  %vm601_vm13 = vcmask 932871  }
 0x11e   : > { %287 = vst [vmem:[#allocation2 + $0x8] sm:$0x2] %v286_v37 }
 0x11f   : > { %v378_v41 = vpop.permute.xlu0 %377 }
 0x120   : > { %v323_v42 = vpop.permute.xlu1 %322  ;;  %v392_v43 = vsel %vm390_vm2, %v378_v41, %v391_v38  ;;  %vm1128_vm2 = vmand %vm1335_vm14, %vm437_vm5  ;;  %vm485_vm5 = vcmask 965632  }
 0x121   : > { %v327_v44 = vsel %vm326_vm3, %v323_v42, %v325_v34  ;;  %393 = vst [vmem:[#allocation2 + $0x8] sm:$0x8] %v392_v43  ;;  %vm543_vm3 = vsmask.f32 6400 }
 0x122   : > { %v334_v45 = vsel %vm1110_vm4, %v327_v44, %v333_v40  ;;  %vm548_vm4 = vcmask 948230  }
 0x123   : > { %335 = vst [vmem:[#allocation2] sm:$0x4] %v334_v45  ;;  %v431_v49 = vpop.permute.xlu0 %430 }
 0x124   : > { %v376_v50 = vpop.permute.xlu1 %375  ;;  %v445_v51 = vsel %vm443_vm8, %v431_v49, %v444_v46  ;;  %vm549_vm8 = vmand %vm548_vm4, %vm543_vm3  ;;  %v366_v36 = vld [vmem:[#allocation2 + $0x8] sm:$0x4] }
 0x125   : > { %v380_v52 = vsel %vm379_vm10, %v376_v50, %v378_v41  ;;  %446 = vst [vmem:[#allocation2 + $0x8] sm:$0x10] %v445_v51  ;;  %vm1137_vm10 = vmand %vm1332_vm6, %vm490_vm12  ;;  %vm538_vm12 = vcmask 949248   ;;  %vm1333_vm6 = vcmask 1047559   ;;  %v313_v34 = vld [vmem:[#allocation2 + $0x8] sm:$0x2] }
 0x126   : > { %v387_v53 = vsel %vm1119_vm9, %v380_v52, %v386_v48  ;;  %vm596_vm9 = vsmask.f32 7424 }
 0x127   : > { %388 = vst [vmem:[#allocation2] sm:$0x8] %v387_v53  ;;  %v484_v57 = vpop.permute.xlu0 %483 }
 0x128   : > { %v429_v58 = vpop.permute.xlu1 %428  ;;  %v498_v59 = vsel %vm496_vm0, %v484_v57, %v497_v54  ;;  %vm1334_vm0 = vcmask 1046534   ;;  %v419_v53 = vld [vmem:[#allocation2 + $0x8] sm:$0x8] }
 0x129   : > { %v433_v60 = vsel %vm432_vm15, %v429_v58, %v431_v49  ;;  %499 = vst [vmem:[#allocation2 + $0x8] sm:$0x20] %v498_v59  ;;  %vm602_vm15 = vmand %vm601_vm13, %vm596_vm9 }
 0x12a   : > { %v440_v61 = vsel %vm1128_vm2, %v433_v60, %v439_v56  ;;  %vm277_vm2 = vcmask 1041409   ;;  %vm1146_vm4 = vmand %vm1334_vm0, %vm543_vm3  ;;  %vm591_vm3 = vcmask 932864   ;;  %vm355_vm0 = vcmask 1006592   ;;  %v361_v38 = vld [vmem:[#allocation2] sm:$0x4] }
 0x12b   : > { %441 = vst [vmem:[#allocation2] sm:$0x10] %v440_v61  ;;  %v537_v1 = vpop.permute.xlu0 %536  ;;  %vm1160_vm13 = vmand %vm1333_vm6, %vm596_vm9  ;;  %vm412_vm9 = vsmask.f32 7950  ;;  %vm465_vm6 = vsmask.f32 7954 }
 0x12c   : > { %v482_v2 = vpop.permute.xlu1 %481  ;;  %v551_v3 = vsel %vm549_vm8, %v537_v1, %v550_v62  ;;  %vm1152_vm8 = vmand %vm277_vm2, %vm278_vm11  ;;  %vm306_vm11 = vsmask.f32 7942  ;;  %v472_v54 = vld [vmem:[#allocation2 + $0x8] sm:$0x10] }
 0x12d   : > { %v486_v4 = vsel %vm485_vm5, %v482_v2, %v484_v57  ;;  %552 = vst [vmem:[#allocation2 + $0x8] sm:$0x40] %v551_v3  ;;  %vm273_vm5 = vcmask 1031168  }
 0x12e   : > { %v493_v5 = vsel %vm1137_vm10, %v486_v4, %v492_v0  ;;  %vm359_vm10 = vsmask.f32 7946  ;;  %v414_v56 = vld [vmem:[#allocation2] sm:$0x8] }
 0x12f   : > { %494 = vst [vmem:[#allocation2] sm:$0x20] %v493_v5  ;;  %v590_v9 = vpop.permute.xlu0 %589 }
 0x130   : > { %v535_v10 = vpop.permute.xlu1 %534  ;;  %v604_v11 = vsel %vm602_vm15, %v590_v9, %v603_v6  ;;  %vm311_vm15 = vcmask 1016833  }
 0x131   : > { %v539_v12 = vsel %vm538_vm12, %v535_v10, %v537_v1  ;;  %605 = vst [vmem:[#allocation2 + $0x8] sm:$0x80] %v604_v11  ;;  %vm364_vm12 = vcmask 1001474  }
 0x132   : > { %v546_v14 = vsel %vm1146_vm4, %v539_v12, %v545_v8  ;;  %vm1167_vm4 = vmand %vm330_vm1, %vm359_vm10  ;;  %vm470_vm1 = vcmask 970756   ;;  %v467_v62 = vld [vmem:[#allocation2] sm:$0x10] }
 0x133   : > { %547 = vst [vmem:[#allocation2] sm:$0x40] %v546_v14  ;;  %v270_v19 = vpop.permute.xlu0 %269  ;;  %vm1181_vm14 = vmand %vm364_vm12, %vm359_vm10  ;;  %vm302_vm10 = vcmask 1022976   ;;  %vm408_vm12 = vcmask 990208  }
 0x134   : > { %v588_v18 = vpop.permute.xlu1 %587  ;;  %v274_v21 = vsel %vm273_vm5, %v270_v19, %v1104_v35  ;;  %vm1193_vm5 = vmand %vm383_vm7, %vm412_vm9  ;;  %v578_v10 = vld [vmem:[#allocation2 + $0x8] sm:$0x40] }
 0x135   : > { %v592_v20 = vsel %vm591_vm3, %v588_v18, %v590_v9  ;;  %v281_v24 = vsel %vm1152_vm8, %v274_v21, %v280_v17  ;;  %vm1176_vm3 = vmand %vm311_vm15, %vm306_vm11  ;;  %vm417_vm8 = vcmask 986115   ;;  %vm624_vm15 = vsmask.f32 7966  ;;  %v525_v9 = vld [vmem:[#allocation2 + $0x8] sm:$0x20] }
 0x136   : > { %v599_v23 = vsel %vm1160_vm13, %v592_v20, %v598_v16  ;;  %282 = vst [vmem:[#allocation2] sm:$0x2] %v281_v24  ;;  %vm1187_vm13 = vmand %vm277_vm2, %vm306_vm11  ;;  %vm461_vm2 = vcmask 973824   ;;  %v520_v12 = vld [vmem:[#allocation2] sm:$0x20] }
 0x137   : > { %600 = vst [vmem:[#allocation2] sm:$0x80] %v599_v23  ;;  %v889_v28 = vpop.permute.xlu0 %888  ;;  %vm1204_vm7 = vmand %vm417_vm8, %vm412_vm9  ;;  %vm576_vm9 = vcmask 940038  }
 0x138   : > { %v884_v26 = vpop.permute.xlu1 %883  ;;  %v891_v31 = vunpack.i.h.bf16 %v889_v28  ;;  %v890_v32 = vunpack.i.l.bf16 %v889_v28  ;;  %vm1212_vm11 = vmand %vm470_vm1, %vm465_vm6  ;;  %vm567_vm1 = vcmask 941056   ;;  %v631_v23 = vld [vmem:[#allocation2 + $0x8] sm:$0x80] }
 0x139   : > { %v886_v30 = vunpack.i.h.bf16 %v884_v26  ;;  %v885_v35 = vunpack.i.l.bf16 %v884_v26 }
 0x13a   : > { %v367_v39 = vsel %vm1181_vm14, %v891_v31, %v366_v36  ;;  %v356_v40 = vsel %vm355_vm0, %v890_v32, %v891_v31  ;;  %vm514_vm14 = vcmask 957440   ;;  %vm523_vm0 = vcmask 955397   ;;  %v573_v17 = vld [vmem:[#allocation2] sm:$0x40] }
 0x13b   : > { %v314_v37 = vsel %vm1176_vm3, %v886_v30, %v313_v34  ;;  %368 = vst [vmem:[#allocation2 + $0x8] sm:$0x4] %v367_v39  ;;  %v362_v42 = vsel %vm1167_vm4, %v356_v40, %v361_v38  ;;  %v899_v45 = vpop.permute.xlu0 %898  ;;  %vm1366_vm3 = vcmask 1044484   ;;  %v303_v51 = vsel %vm302_vm10, %v885_v35, %v886_v30 }
 0x13c   : > { %315 = vst [vmem:[#allocation2 + $0x8] sm:$0x2] %v314_v37  ;;  %v894_v43 = vpop.permute.xlu1 %893  ;;  %vm1218_vm8 = vmand %vm1366_vm3, %vm465_vm6  ;;  %v901_v49 = vunpack.i.h.bf16 %v899_v45  ;;  %v900_v50 = vunpack.i.l.bf16 %v899_v45  ;;  %vm1369_vm6 = vsmask.f32 7958  ;;  %vm620_vm3 = vcmask 924672  }
 0x13d   : > { %363 = vst [vmem:[#allocation2] sm:$0x4] %v362_v42  ;;  %v896_v47 = vunpack.i.h.bf16 %v894_v43  ;;  %v895_v48 = vunpack.i.l.bf16 %v894_v43  ;;  %v308_v52 = vld [vmem:[#allocation2] sm:$0x2]  ;;  %vm1232_vm4 = vmand %vm523_vm0, %vm1369_vm6 }
 0x13e   : > { %v309_v55 = vsel %vm1187_vm13, %v303_v51, %v308_v52  ;;  %v473_v59 = vsel %vm1212_vm11, %v901_v49, %v472_v54  ;;  %v462_v63 = vsel %vm461_vm2, %v900_v50, %v901_v49  ;;  %vm1372_vm13 = vsmask.f32 7962  ;;  %v626_v24 = vld [vmem:[#allocation2] sm:$0x80] }
 0x13f   : > { %v420_v57 = vsel %vm1204_vm7, %v896_v47, %v419_v53  ;;  %v409_v58 = vsel %vm408_vm12, %v895_v48, %v896_v47  ;;  %310 = vst [vmem:[#allocation2] sm:$0x2] %v309_v55  ;;  %474 = vst [vmem:[#allocation2 + $0x8] sm:$0x10] %v473_v59  ;;  %v909_v2 = vpop.permute.xlu0 %908  ;;  %vm629_vm12 = vcmask 924679   ;;  %vm1376_vm11 = vcmask 1045509  }
 0x140   : > { %421 = vst [vmem:[#allocation2 + $0x8] sm:$0x8] %v420_v57  ;;  %v415_v61 = vsel %vm1193_vm5, %v409_v58, %v414_v56  ;;  %v904_v0 = vpop.permute.xlu1 %903  ;;  %vm1241_vm10 = vmand %vm576_vm9, %vm1372_vm13  ;;  %v468_v4 = vsel %vm1218_vm8, %v462_v63, %v467_v62  ;;  %v911_v7 = vunpack.i.h.bf16 %v909_v2  ;;  %vm1380_vm2 = vcmask 1046534  }
 0x141   : > { %vm1375_vm7 = vmmov %vm1369_vm6  ;;  %416 = vst [vmem:[#allocation2] sm:$0x8] %v415_v61  ;;  %v906_v5 = vunpack.i.h.bf16 %v904_v0  ;;  %v905_v6 = vunpack.i.l.bf16 %v904_v0  ;;  %v910_v11 = vunpack.i.l.bf16 %v909_v2  ;;  %vm1383_vm6 = vcmask 1047559  }
 0x142   : > { %vm1247_vm0 = vmand %vm1376_vm11, %vm1375_vm7  ;;  %469 = vst [vmem:[#allocation2] sm:$0x10] %v468_v4  ;;  %v579_v15 = vsel %vm1241_vm10, %v911_v7, %v578_v10 }
 0x143   : > { %vm1379_vm5 = vmmov %vm1372_vm13  ;;  %v526_v13 = vsel %vm1232_vm4, %v906_v5, %v525_v9  ;;  %v515_v14 = vsel %vm514_vm14, %v905_v6, %v906_v5  ;;  %580 = vst [vmem:[#allocation2 + $0x8] sm:$0x40] %v579_v15  ;;  %v568_v18 = vsel %vm567_vm1, %v910_v11, %v911_v7 }
 0x144   : > { %vm1255_vm9 = vmand %vm1380_vm2, %vm1379_vm5  ;;  %527 = vst [vmem:[#allocation2 + $0x8] sm:$0x20] %v526_v13  ;;  %v521_v16 = vsel %vm1247_vm0, %v515_v14, %v520_v12  ;;  %v914_v19 = vpop.permute.xlu1 %913 }
 0x145   : > { %vm630_vm8 = vmand %vm629_vm12, %vm624_vm15  ;;  %522 = vst [vmem:[#allocation2] sm:$0x20] %v521_v16  ;;  %v574_v20 = vsel %vm1255_vm9, %v568_v18, %v573_v17  ;;  %v916_v21 = vunpack.i.h.bf16 %v914_v19  ;;  %v915_v22 = vunpack.i.l.bf16 %v914_v19 }
 0x146   : > { %vm625_vm4 = vmand %vm1383_vm6, %vm624_vm15  ;;  %575 = vst [vmem:[#allocation2] sm:$0x40] %v574_v20  ;;  %vm638_vm15 = vcmask 130048  }
 0x147   : > { %v632_v25 = vsel %vm630_vm8, %v916_v21, %v631_v23  ;;  %v621_v26 = vsel %vm620_vm3, %v915_v22, %v916_v21 }
 0x148   : > { %633 = vst [vmem:[#allocation2 + $0x8] sm:$0x80] %v632_v25  ;;  %v627_v27 = vsel %vm625_vm4, %v621_v26, %v626_v24 }
 0x149   : > { %628 = vst [vmem:[#allocation2] sm:$0x80] %v627_v27 }
 0x150   : > { %v634_v28 = vld [vmem:[#allocation2] sm:$0xff] }
 0x151   : > { %800 = vmatpush3.bf16.msra.mxu0 %v634_v28 }
 0x154   : > { %802 = vmatmul.mubr.msk.bf16.vlgmr.msra.gmra.mrb[0].mxu0 %vm638_vm15, %v636_v29 }
 0x227   : > { %v676_v30 = vpop.f32.mrb[0].mxu0 }
 0x228   : > { %682 = vst [vmem:[%s209_s10] sm:$0xff] %v676_v30  ;;  %v803_v31 = vpop.f32.mrb[1].mxu0 }
 0x229   : > { %v679_v32 = vpop.f32.mrb[2].mxu0 }
 0x22a   : > { %930 = shalt.err (!%p927_p5)
}
 0x22b   : > { %s931_s30 = scalar_lea.hbm %s1283_s23, 128  ;;  %s935_s6 = scalar_lea.hbm %s1331_s3, 256 }
 0x22c   : > { %p932_p6 = scmp.ne.s32.totalorder %s1283_s23, %s931_s30  ;;  %p936_p10 = scmp.lt.u32.totalorder %s1283_s23, %s1331_s3 }
 0x22d   : > { %p937_p11 = scmp.lt.u32.totalorder %s935_s6, %s931_s30  ;;  %p939_p13 = scmp.lt.u32.totalorder %s931_s30, %s1283_s23 }
 0x22e   : > { %p933_p7 = pnand %p932_p6, %p1075_p4 }
 0x22f   : > { %p938_p12 = por %p937_p11, %p936_p10 }
 0x230   : > { %p934_p9 = pneg %p933_p7 }
 0x231   : > { %p940_p0 = por %p939_p13, %p938_p12 }
 0x233   : > { %p941_p1 = pnand %p940_p0, %p934_p9 }
 0x235   : > { %944 = shalt.err (!%p941_p1)
}
 0x236   : > { %805 = dma.vmem_to_hbm [thread:$0]  (%p1075_p4), %s1278_s11, 128, %s1283_s23, %s684_s26   ;;  %v804_v33 = vpop.f32.mrb[3].mxu0 }
 0x237 PF: > { %p811_p2 = scmp.ge.s32.totalorder %s995_s17, 2  ;;  %s710_s9 = sand.u32 1, %s975_s12  }
 0x238   : > { %s711_s10 = scalar_lea.sflag [#allocation5], %s710_s9 }
 0x239   : > { %p808_p3 = pnand %p811_p2, %p1082_p8 }
 0x23b   : > { %970 = dma.done.wait (!%p808_p3), %s711_s10, 128  }
 0x23c   : > { %972 = vsyncadd (!%p808_p3), %s711_s10, 4294967168  ;;  %s16_s17 = sadd.s32 1, %s995_s17   ;;  %s1384_s12 = smov %s979_s13 }
 0x23d   : > { %p13_p5 = scmp.ge.s32.totalorder %s16_s17, 4   ;;  %s1385_s13 = smov %s983_s14 }
 0x23e   : > { %s1386_s14 = smov %s1088_s25  ;;  %s1387_s15 = smov %s991_s16 }
 0x23f   : > { %s1388_s16 = smov %s1390_s20  ;;  %15 = sbr.rel (!%p13_p5) target bundleno = 4 (0x4), region = 70 }
 0x246   :  { %716 = vsyncpa [#allocation5], 1 }
 0x247   :  { %718 = vsyncpa [#allocation5 + $0x1], 1 }

</bundles_post_ra>
